<compile_context>
chip_gen: v7x
topology: tpu7x:2x2x1
jax: 0.10.0
libtpu: 0.0.40
codegen_flags: <defaults>
</compile_context>

<pallas_src>
import jax
import jax.numpy as jnp
from jax.experimental import pallas as pl
from jax.experimental.pallas import tpu as pltpu


def _discriminator_kernel(xT_ref, w1_ref, b1_ref, w2_ref, b2_ref, out_ref):
    xT = xT_ref[...]                      # (input_dim, TB)  f32, batch on lanes
    w1 = w1_ref[...]                      # (H, input_dim)
    input_dim = xT.shape[0]

    # Linear(input_dim -> H) as a chain of VPU FMAs (no MXU push/pop round-trip).
    h = w1[:, 0:1] * xT[0:1, :]           # (H, TB)
    for k in range(1, input_dim):
        h = h + w1[:, k:k + 1] * xT[k:k + 1, :]
    h = h + b1_ref[...]                   # (H, 1) broadcast over lanes

    # LeakyReLU(0.2): single VPU max instead of cmp+select.
    h = jnp.maximum(h, 0.2 * h)

    # Linear(H -> 1): per-sublane scale + 16-wide sublane reduction (XLU), not a matmul.
    y = jnp.sum(w2_ref[...] * h, axis=0, keepdims=True) + b2_ref[0]   # (1, TB)

    # Sigmoid: exp and approx reciprocal both land on the (otherwise idle) EUP slot.
    out_ref[...] = pl.reciprocal(1.0 + jnp.exp(-y), approx=True).astype(out_ref.dtype)


def discriminator_forward(x, w1, b1, w2, b2, *, tb=None):
    """x: (B, input_dim) f32 -> (B, 1) f32 (matches PyTorch Discriminator.forward)."""
    B, input_dim = x.shape
    H = w1.shape[0]
    if tb is None:
        # Larger batch tiles amortize the ~0.35 us/step grid overhead; 128 is the minimum
        # lane-dense tile. Either choice is tiny vs. v7x's 64 MiB VMEM (f32 tiles of a few KiB).
        tb = 512 if B >= 512 else 128
    B_pad = pl.cdiv(B, tb) * tb

    # Put batch on the lane (last) axis: lane-dense loads/stores, full-width VPU/EUP ops.
    xT = jnp.zeros((input_dim, B_pad), jnp.float32).at[:, :B].set(x.T)

    outT = pl.pallas_call(
        _discriminator_kernel,
        out_shape=jax.ShapeDtypeStruct((1, B_pad), jnp.float32),
        grid=(B_pad // tb,),
        in_specs=[
            pl.BlockSpec((input_dim, tb), lambda i: (0, i)),    # x tile, streamed per grid step
            pl.BlockSpec((H, input_dim), lambda i: (0, 0)),     # weights stay VMEM-resident
            pl.BlockSpec((H, 1), lambda i: (0, 0)),
            pl.BlockSpec((H, 1), lambda i: (0, 0)),
            pl.BlockSpec(memory_space=pltpu.MemorySpace.SMEM),  # b2: 1-cycle scalar load
        ],
        out_specs=pl.BlockSpec((1, tb), lambda i: (0, i)),      # lane-dense output slab
        compiler_params=pltpu.CompilerParams(
            dimension_semantics=("parallel",),                  # megacore split on v7x; no-op on v5e/v6e
        ),
    )(xT, w1, b1, w2, b2)

    return outT[:, :B].T                                        # back to PyTorch (B, 1)


def init_params(key, input_dim, hidden=16):
    """PyTorch nn.Linear default init: U(-1/sqrt(fan_in), 1/sqrt(fan_in))."""
    k1, k2, k3, k4 = jax.random.split(key, 4)
    bound1 = 1.0 / jnp.sqrt(input_dim)
    bound2 = 1.0 / jnp.sqrt(hidden)
    w1 = jax.random.uniform(k1, (hidden, input_dim), jnp.float32, -bound1, bound1)
    b1 = jax.random.uniform(k2, (hidden, 1), jnp.float32, -bound1, bound1)
    w2 = jax.random.uniform(k3, (hidden, 1), jnp.float32, -bound2, bound2)
    b2 = jax.random.uniform(k4, (1,), jnp.float32, -bound2, bound2)
    return w1, b1, w2, b2


def _reference(x, w1, b1, w2, b2):
    h = x @ w1.T + b1.T
    h = jnp.where(h > 0, h, 0.2 * h)
    return jax.nn.sigmoid(h @ w2 + b2)


if __name__ == "__main__":
    key = jax.random.PRNGKey(0)
    k_x, k_x2, k_p = jax.random.split(key, 3)

    input_dim = 2                      # two-dimensional Gaussian discriminator
    w1, b1, w2, b2 = init_params(k_p, input_dim)

    # Lane-dense batch (multiple of 128) -> grid of 2 parallel tiles.
    batch = 256
    x = jax.random.normal(k_x, (batch, input_dim), jnp.float32)
    out = jax.block_until_ready(discriminator_forward(x, w1, b1, w2, b2))
    ref = _reference(x, w1, b1, w2, b2)
    assert out.shape == (batch, 1)
    assert jnp.allclose(out, ref, atol=2e-3), "mismatch vs reference (batch=256)"

    # Ragged batch exercises the pad/slice path.
    x2 = jax.random.normal(k_x2, (37, input_dim), jnp.float32)
    out2 = jax.block_until_ready(discriminator_forward(x2, w1, b1, w2, b2))
    ref2 = _reference(x2, w1, b1, w2, b2)
    assert out2.shape == (37, 1)
    assert jnp.allclose(out2, ref2, atol=2e-3), "mismatch vs reference (batch=37)"

    print("KERNEL_OK")
</pallas_src>

<mosaic_0001>
module attributes {stable_mosaic.version = 11 : i64} {
  func.func @_discriminator_kernel(%arg0: i32, %arg1: memref<2x128xf32, #tpu.memory_space<vmem>>, %arg2: memref<16x2xf32, #tpu.memory_space<vmem>>, %arg3: memref<16x1xf32, #tpu.memory_space<vmem>>, %arg4: memref<16x1xf32, #tpu.memory_space<vmem>>, %arg5: memref<1xf32, #tpu.memory_space<smem>>, %arg6: memref<1x128xf32, #tpu.memory_space<vmem>>) attributes {dimension_semantics = [#tpu.dimension_semantics<parallel>], iteration_bounds = array<i64: 2>, scalar_prefetch = 0 : i64, scratch_operands = 0 : i64, tpu.core_type = #tpu.core_type<tc>, window_params = [{transform_indices = @transform_0, window_bounds = array<i64: 2, 128>}, {pipeline_mode = #tpu.pipeline_mode<synchronous>, transform_indices = @transform_1, window_bounds = array<i64: 16, 2>}, {pipeline_mode = #tpu.pipeline_mode<synchronous>, transform_indices = @transform_2, window_bounds = array<i64: 16, 1>}, {pipeline_mode = #tpu.pipeline_mode<synchronous>, transform_indices = @transform_3, window_bounds = array<i64: 16, 1>}, {transform_indices = @transform_4, window_bounds = array<i64: 1>}, {transform_indices = @transform_5, window_bounds = array<i64: 1, 128>}]} {
    %c0 = arith.constant 0 : index
    %c0_0 = arith.constant 0 : index
    %0 = vector.load %arg1[%c0, %c0_0] : memref<2x128xf32, #tpu.memory_space<vmem>>, vector<2x128xf32>
    %c0_1 = arith.constant 0 : index
    %c0_2 = arith.constant 0 : index
    %1 = vector.load %arg2[%c0_1, %c0_2] : memref<16x2xf32, #tpu.memory_space<vmem>>, vector<16x2xf32>
    %2 = vector.extract_strided_slice %1 {offsets = [0, 0], sizes = [16, 1], strides = [1, 1]} : vector<16x2xf32> to vector<16x1xf32>
    %3 = vector.extract_strided_slice %0 {offsets = [0, 0], sizes = [1, 128], strides = [1, 1]} : vector<2x128xf32> to vector<1x128xf32>
    %4 = vector.broadcast %2 : vector<16x1xf32> to vector<16x128xf32>
    %5 = vector.broadcast %3 : vector<1x128xf32> to vector<16x128xf32>
    %6 = arith.mulf %4, %5 : vector<16x128xf32>
    %7 = vector.extract_strided_slice %1 {offsets = [0, 1], sizes = [16, 1], strides = [1, 1]} : vector<16x2xf32> to vector<16x1xf32>
    %8 = vector.extract_strided_slice %0 {offsets = [1, 0], sizes = [1, 128], strides = [1, 1]} : vector<2x128xf32> to vector<1x128xf32>
    %9 = vector.broadcast %7 : vector<16x1xf32> to vector<16x128xf32>
    %10 = vector.broadcast %8 : vector<1x128xf32> to vector<16x128xf32>
    %11 = arith.mulf %9, %10 : vector<16x128xf32>
    %12 = arith.addf %6, %11 : vector<16x128xf32>
    %c0_3 = arith.constant 0 : index
    %c0_4 = arith.constant 0 : index
    %13 = vector.load %arg3[%c0_3, %c0_4] : memref<16x1xf32, #tpu.memory_space<vmem>>, vector<16x1xf32>
    %14 = vector.broadcast %13 : vector<16x1xf32> to vector<16x128xf32>
    %15 = arith.addf %12, %14 : vector<16x128xf32>
    %cst = arith.constant 2.000000e-01 : f32
    %16 = vector.broadcast %cst : f32 to vector<16x128xf32>
    %17 = arith.mulf %16, %15 : vector<16x128xf32>
    %18 = arith.maximumf %15, %17 : vector<16x128xf32>
    %c0_5 = arith.constant 0 : index
    %c0_6 = arith.constant 0 : index
    %19 = vector.load %arg4[%c0_5, %c0_6] : memref<16x1xf32, #tpu.memory_space<vmem>>, vector<16x1xf32>
    %20 = vector.broadcast %19 : vector<16x1xf32> to vector<16x128xf32>
    %21 = arith.mulf %20, %18 : vector<16x128xf32>
    %cst_7 = arith.constant dense<0.000000e+00> : vector<128xf32>
    %22 = vector.multi_reduction <add>, %21, %cst_7 [0] : vector<16x128xf32> to vector<128xf32>
    %23 = vector.shape_cast %22 : vector<128xf32> to vector<1x128xf32>
    %c0_8 = arith.constant 0 : index
    %24 = memref.load %arg5[%c0_8] : memref<1xf32, #tpu.memory_space<smem>>
    %25 = vector.broadcast %24 : f32 to vector<1x128xf32>
    %26 = arith.addf %23, %25 : vector<1x128xf32>
    %cst_9 = arith.constant 0.000000e+00 : f32
    %27 = vector.broadcast %cst_9 : f32 to vector<1x128xf32>
    %28 = arith.subf %27, %26 : vector<1x128xf32>
    %29 = math.exp %28 : vector<1x128xf32>
    %cst_10 = arith.constant 1.000000e+00 : f32
    %30 = vector.broadcast %cst_10 : f32 to vector<1x128xf32>
    %31 = arith.addf %30, %29 : vector<1x128xf32>
    %32 = tpu.reciprocal %31 {approx = true} : vector<1x128xf32> -> vector<1x128xf32>
    %c0_11 = arith.constant 0 : index
    %c0_12 = arith.constant 0 : index
    %33 = vector.load %arg6[%c0_11, %c0_12] : memref<1x128xf32, #tpu.memory_space<vmem>>, vector<1x128xf32>
    tpu.vector_store %arg6[%c0_11, %c0_12], %32 {strides = array<i32>} : memref<1x128xf32, #tpu.memory_space<vmem>>, vector<1x128xf32>,
    return
  }
  func.func @transform_0(%arg0: i32) -> (i32, i32) {
    %c0_i32 = arith.constant 0 : i32
    %c0_i32_0 = arith.constant 0 : i32
    return %c0_i32, %arg0 : i32, i32
  }
  func.func @transform_1(%arg0: i32) -> (i32, i32) {
    %c0_i32 = arith.constant 0 : i32
    %c0_i32_0 = arith.constant 0 : i32
    %c0_i32_1 = arith.constant 0 : i32
    return %c0_i32, %c0_i32_0 : i32, i32
  }
  func.func @transform_2(%arg0: i32) -> (i32, i32) {
    %c0_i32 = arith.constant 0 : i32
    %c0_i32_0 = arith.constant 0 : i32
    %c0_i32_1 = arith.constant 0 : i32
    return %c0_i32, %c0_i32_0 : i32, i32
  }
  func.func @transform_3(%arg0: i32) -> (i32, i32) {
    %c0_i32 = arith.constant 0 : i32
    %c0_i32_0 = arith.constant 0 : i32
    %c0_i32_1 = arith.constant 0 : i32
    return %c0_i32, %c0_i32_0 : i32, i32
  }
  func.func @transform_4(%arg0: i32) -> i32 {
    %c0_i32 = arith.constant 0 : i32
    %c0_i32_0 = arith.constant 0 : i32
    return %c0_i32 : i32
  }
  func.func @transform_5(%arg0: i32) -> (i32, i32) {
    %c0_i32 = arith.constant 0 : i32
    %c0_i32_0 = arith.constant 0 : i32
    return %c0_i32, %arg0 : i32, i32
  }
}

</mosaic_0001>

<bundles_post_ra>
// kernel: tpu_custom_call.1
= control target key start
LH: loop header
LB: loop body
LE: loop exit
PB: predicated region body
PF: predicated region fallthrough
CT: control target
= control target key end

     0   :  { %s645_s0 = inlined_call_operand.vmem [shape: f32[2,256], index: 0, kind: input, shape index: {}]   ;;  %s646_s1 = inlined_call_operand.vmem [shape: f32[16,2], index: 1, kind: input, shape index: {}]   ;;  %s647_s2 = inlined_call_operand.vmem [shape: f32[16,1], index: 2, kind: input, shape index: {}]   ;;  %s648_s3 = inlined_call_operand.vmem [shape: f32[16,1], index: 3, kind: input, shape index: {}]   ;;  %s649_s4 = inlined_call_operand.<no memory space> [shape: f32[1], index: 4, kind: input, shape index: {}]   ;;  %s650_s5 = inlined_call_operand.hbm [shape: f32[1,256], index: 5, kind: output, shape index: {}]  }
   0x1   :  { %10 = sst [smem:[#allocation2]] %s649_s4 }
   0x2   :  { %11 = vsyncpa [#allocation4], 0 }
   0x3   :  { %13 = vsyncpa [#allocation4 + $0x1], 0  ;;  %s527_s20 = smov 0   ;;  %s529_s21 = smov 0  }
   0x4   :  { %s531_s22 = smov 0   ;;  %s533_s23 = smov 0  }
   0x5 LB: > { %s548_s4 = sadd.s32 4294967295, %s489_s23   ;;  %s371_s24 = sadd.s32 4294967294, %s489_s23   ;;  %s489_s23 = sphi %s533_s23, %s656_s23   ;;  %s485_s22 = sphi %s531_s22, %s655_s22   ;;  %s481_s21 = sphi %s529_s21, %s654_s21   ;;  %s477_s20 = sphi %s527_s20, %s653_s20  }
   0x6   : > { %s552_s25 = sadd.s32 1, %s489_s23   ;;  %s136_s26 = sadd.s32 1, %s485_s22 }
   0x7   : > { %s133_s27 = ssub.s32 %s489_s23, %s552_s25  ;;  %p146_p0 = scmp.ne.s32.totalorder %s485_s22, %s481_s21 }
   0x8   : > { %p134_p1 = scmp.eq.s32.totalorder %s133_s27, 0  ;;  %p147_p2 = scmp.eq.s32.totalorder %s548_s4, 1 }
   0x9   : > { %p152_p3 = scmp.ne.s32.totalorder %s481_s21, %s477_s20  ;;  %p153_p4 = scmp.eq.s32.totalorder %s371_s24, 1 }
   0xa   : > { %s563_s28 = scalar_select %p134_p1, %s485_s22, %s136_s26  }
   0xb   : > { %p565_p5 = por %p147_p2, %p146_p0  ;;  %p569_p6 = por %p153_p4, %p152_p3 }
   0xc   : > { %p374_p7 = scmp.ge.s32.totalorder %s489_s23, 1  ;;  %p190_p8 = scmp.lt.s32.totalorder %s489_s23, 3 }
   0xe   : > { %p191_p9 = pnand %p374_p7, %p190_p8 }
   0xf   : > { %v221_v0 = vld [vmem:[%s646_s1] sm:$0xff] (!%p191_p9)  ;;  %v491_v1 = vmov (!%p191_p9), 1   ;;  %v492_v2 = vmov (!%p191_p9), 0   ;;  %v222_v3 = vld [vmem:[%s646_s1 + $0x8] sm:$0xff] (!%p191_p9)  ;;  %p216_p10 = scmp.lt.s32.totalorder (!%p191_p9), %s548_s4, 1  ;;  %v233_v8 = vlaneseq (!%p191_p9)  ;;  %s294_s6 = sld [smem:[#allocation2]] (!%p191_p9) }
  0x10   : > { %194 = sbr.rel (%p191_p9) target bundleno = 220 (0xdc), region = 40  ;;  %421 = vset.pattern.permute.xlu1 (!%p191_p9), %v491_v1  ;;  %420 = vset.pattern.permute.xlu0 (!%p191_p9), %v492_v2  ;;  %v255_v4 = vld [vmem:[%s647_s2] sm:$0xff] (!%p191_p9)  ;;  %v256_v5 = vld [vmem:[%s647_s2 + $0x8] sm:$0xff] (!%p191_p9)  ;;  %s214_s7 = sand.u32 (!%p191_p9), 1, %s481_s21  }
  0x11   : > { %240 = vperm.xlu1 (!%p191_p9), %421, %v221_v0   ;;  %225 = vperm.xlu0 (!%p191_p9), %420, %v221_v0   ;;  %v273_v6 = vld [vmem:[%s648_s3] sm:$0xff] (!%p191_p9)  ;;  %v274_v7 = vld [vmem:[%s648_s3 + $0x8] sm:$0xff] (!%p191_p9)  ;;  %v234_v9 = vshrl.u32 (!%p191_p9), %v233_v8, 7  ;;  %s376_s8 = sshll.u32 (!%p191_p9), %s548_s4, 4  ;;  %s215_s9 = scalar_lea.vmem (!%p191_p9), [#allocation3], %s214_s7 }
  0x12   : > { %s316_s10 = sshll.u32 (!%p191_p9), %s215_s9, 4  ;;  %s603_s13 = scalar_lea.hbm (!%p191_p9), %s650_s5, %s376_s8  ;;  %s605_s10 = int_to_ptr.vmem [resolvable:$true] %s316_s10 }
  0x13   : > { %v249_v10 = vsub.s32 (!%p191_p9), 1, %v234_v9  ;;  %v235_v11 = vsub.s32 (!%p191_p9), 0, %v234_v9  ;;  %s304_s14 = scalar_lea.sflag (!%p191_p9), [#allocation4], %s214_s7  ;;  %s427_s15 = scalar_lea.vmem (!%p191_p9), %s605_s10, 16 }
  0x14   : > { %p428_p11 = scmp.ne.s32.totalorder (!%p191_p9), %s605_s10, %s427_s15 }
  0x15   : > { %244 = vperm.xlu1 (!%p191_p9), %421, %v222_v3   ;;  %230 = vperm.xlu0 (!%p191_p9), %420, %v222_v3   ;;  %v295_v43 = vstv (!%p191_p9), %s294_s6 }
  0x16   : > { %p429_p12 = pnand (!%p191_p9), %p428_p11, %p565_p5 }
  0x17   : > { %s217_s18 = scalar_select %p216_p10, %s548_s4, 1 }
  0x18   : > { %p430_p13 = pneg %p429_p12  ;;  %s493_s4 = smov [#allocation3]  }
  0x19   : > { %422 = vset.pattern.permute.xlu1 %v492_v2  ;;  %259 = vperm.xlu0 %420, %v255_v4   ;;  %s375_s19 = sshll.u32 %s217_s18, 1  ;;  %s431_s16 = sshll.u32 %s493_s4, 4  ;;  %s432_s16 = int_to_ptr.vmem [resolvable:$false] %s431_s16 }
  0x1a   : > { %264 = vperm.xlu1 %422, %v256_v5   ;;  %s219_s27 = scalar_lea.vmem %s645_s0, %s375_s19  ;;  %s433_s17 = scalar_lea.vmem %s432_s16, 32 }
  0x1b   : > { %v220_v12 = vld [vmem:[%s219_s27] sm:$0x3]  ;;  %p434_p0 = scmp.lt.s32.totalorder %s605_s10, %s432_s16  ;;  %p435_p1 = scmp.lt.s32.totalorder %s433_s17, %s427_s15 }
  0x1c   : > { %v250_v13 = vrot.slane %v220_v12, %v249_v10  ;;  %v236_v14 = vrot.slane %v220_v12, %v235_v11 }
  0x1d   : > { %277 = vperm.xlu0 %420, %v273_v6   ;;  %p436_p2 = por %p435_p1, %p434_p0 }
  0x1e   : > { %282 = vperm.xlu1 %422, %v274_v7  }
  0x1f   : > { %p437_p3 = pnand %p436_p2, %p430_p13 }
  0x90   : > { %v241_v15 = vpop.permute.xlu1 %240  ;;  %v226_v16 = vpop.permute.xlu0 %225 }
  0x91   : > { %v251_v17 = vmul.f32 %v250_v13, %v241_v15  ;;  %v237_v18 = vmul.f32 %v236_v14, %v226_v16 }
  0x93   : > { %v253_v23 = vadd.f32 %v251_v17, %v237_v18 }
  0x94   : > { %v245_v19 = vpop.permute.xlu1 %244  ;;  %v231_v20 = vpop.permute.xlu0 %230 }
  0x95   : > { %v252_v21 = vmul.f32 %v250_v13, %v245_v19  ;;  %v238_v22 = vmul.f32 %v236_v14, %v231_v20 }
  0x97   : > { %v254_v24 = vadd.f32 %v252_v21, %v238_v22 }
  0x98   : > { %v260_v25 = vpop.permute.xlu0 %259 }
  0x99   : > { %v267_v26 = vadd.f32 %v260_v25, %v253_v23  ;;  %v265_v27 = vpop.permute.xlu1 %264 }
  0x9a   : > { %v268_v28 = vadd.f32 %v265_v27, %v254_v24 }
  0x9b   : > { %v269_v29 = vmul.f32 0.2, %v267_v26 }
  0x9c   : > { %v270_v30 = vmul.f32 0.2, %v268_v28  ;;  %v278_v32 = vpop.permute.xlu0 %277 }
  0x9d   : > { %v271_v31 = vmax.f32 %v267_v26, %v269_v29  ;;  %v283_v35 = vpop.permute.xlu1 %282 }
  0x9e   : > { %v272_v33 = vmax.f32 %v268_v28, %v270_v30 }
  0x9f   : > { %v285_v34 = vmul.f32 %v278_v32, %v271_v31 }
  0xa0   : > { %v286_v36 = vmul.f32 %v283_v35, %v272_v33 }
  0xa2   : > { %v287_v37 = vadd.f32 %v286_v36, %v285_v34 }
  0xa4   : > { %v288_v38 = vrot.slane %v287_v37, 4 }
  0xa6   : > { %v289_v39 = vadd.f32 %v288_v38, %v287_v37 }
  0xa8   : > { %v290_v40 = vrot.slane %v289_v39, 2 }
  0xaa   : > { %v291_v41 = vadd.f32 %v290_v40, %v289_v39 }
  0xac   : > { %v292_v42 = vrot.slane %v291_v41, 1 }
  0xae   : > { %v293_v44 = vadd.f32 %v292_v42, %v291_v41 }
  0xb0   : > { %v296_v45 = vadd.f32 %v295_v43, %v293_v44 }
  0xb2   : > { %v297_v46 = vsub.f32 0.0, %v296_v45 }
  0xb4   : > { %v298_v47 = vmul.f32 1.442695, %v297_v46 }
  0xb6   : > { %423 = vpow2.f32 %v298_v47 }
  0xc0   : > { %v424_v48 = vpop.eup %423 }
  0xc1   : > { %v300_v49 = vadd.f32 1.0, %v424_v48 }
  0xc3   : > { %425 = vrcp.f32 %v300_v49 }
  0xcd   : > { %v426_v50 = vpop.eup %425 }
  0xce   : > { %302 = vst [vmem:[%s215_s9] sm:$0x1] %v426_v50 }
  0xcf   : > { %440 = shalt.err (!%p437_p3)
}
  0xd0   : > { %s441_s18 = scalar_lea.hbm %s603_s13, 16  ;;  %s445_s26 = scalar_lea.hbm %s650_s5, 32 }
  0xd1   : > { %p442_p4 = scmp.ne.s32.totalorder %s603_s13, %s441_s18  ;;  %p446_p9 = scmp.lt.u32.totalorder %s603_s13, %s650_s5 }
  0xd2   : > { %p447_p10 = scmp.lt.u32.totalorder %s445_s26, %s441_s18  ;;  %p449_p12 = scmp.lt.u32.totalorder %s441_s18, %s603_s13 }
  0xd3   : > { %p443_p7 = pnand %p442_p4, %p565_p5 }
  0xd4   : > { %p448_p11 = por %p447_p10, %p446_p9 }
  0xd5   : > { %p444_p8 = pneg %p443_p7 }
  0xd6   : > { %p450_p13 = por %p449_p12, %p448_p11 }
  0xd8   : > { %p451_p0 = pnand %p450_p13, %p444_p8 }
  0xda   : > { %454 = shalt.err (!%p451_p0)
}
  0xdb   : > { %379 = dma.vmem_to_hbm [thread:$0]  (%p565_p5), %s605_s10, 16, %s603_s13, %s304_s14  }
  0xdc PF: > { %p385_p1 = scmp.ge.s32.totalorder %s489_s23, 2  ;;  %s328_s7 = sand.u32 1, %s477_s20  }
  0xdd   : > { %s329_s8 = scalar_lea.sflag [#allocation4], %s328_s7 }
  0xde   : > { %p382_p2 = pnand %p385_p1, %p569_p6 }
  0xe0   : > { %472 = dma.done.wait (!%p382_p2), %s329_s8, 16  }
  0xe1   : > { %474 = vsyncadd (!%p382_p2), %s329_s8, 4294967280  ;;  %p16_p3 = scmp.ge.s32.totalorder %s552_s25, 4   ;;  %s653_s20 = smov %s481_s21 }
  0xe2   : > { %s654_s21 = smov %s485_s22  ;;  %s655_s22 = smov %s563_s28 }
  0xe3   : > { %s656_s23 = smov %s552_s25  ;;  %18 = sbr.rel (!%p16_p3) target bundleno = 5 (0x5), region = 75 }
  0xea   :  { %333 = vsyncpa [#allocation4], 1 }
  0xeb   :  { %335 = vsyncpa [#allocation4 + $0x1], 1 }

</bundles_post_ra>
